<compile_context>
chip_gen: v5e
topology: v5e:2x2
jax: 0.10.0
libtpu: 0.0.40
codegen_flags: <defaults>
</compile_context>

<pallas_src>
import functools

import jax
import jax.numpy as jnp
import numpy as np
from jax.experimental import pallas as pl
from jax.experimental.pallas import tpu as pltpu


def _ftdnn_kernel_ctx(xc_ref, xph_ref, xnh_ref, wf_ref, wa_ref, bsb_ref,
                      o_ref, hh_ref, *, tT, c, Cbp, T, bypass_scale):
    """One (batch, time-tile) per grid step, context_size > 0.

    xc_ref  : (1, tT, Cp)      current time tile of x (bf16)
    xph_ref : (1, 8,  Cp)      the 8 frames just before this tile (left halo)
    xnh_ref : (1, 8,  Cp)      the 8 frames just after this tile  (right halo)
    wf_ref  : (Cp, 2*Cbp)      fused factor weights [Wf0 | Wfl]   (bf16)
    wa_ref  : (2*Cbp, Coutp)   fused affine weights [Wa0 ; War]   (bf16)
    bsb_ref : (8, Coutp)       row0 bias, row1 BN scale, row2 BN shift (f32)
    o_ref   : (1, tT, Coutp)   bf16 output tile
    hh_ref  : (tT, 2*Cbp)      f32 scratch holding [h | hs]
    """
    ti = pl.program_id(1)
    t0 = ti * tT

    x_cur = xc_ref[0]                                   # (tT, Cp) bf16
    bias = bsb_ref[0:1, :]
    scale = bsb_ref[1:2, :]
    shift = bsb_ref[2:3, :]

    # ---- factor, fused taps: P = x @ [Wf0 | Wfl]  (one MXU pass) ----
    P = jnp.dot(x_cur, wf_ref[...], preferred_element_type=jnp.float32)
    p0 = P[:, :Cbp]                                     # x[t]   @ Wf0
    pfl = P[:, Cbp:]                                    # x[t]   @ Wfl
    row = jax.lax.broadcasted_iota(jnp.int32, (tT, 1), 0)

    # h[t] = x[t-c] @ Wfl + x[t] @ Wf0 ; shift the product (not x) down by c.
    pfl_s = pltpu.roll(pfl, shift=c, axis=0)            # row r <- pfl[r-c]
    h = p0 + jnp.where(row >= c, pfl_s, 0.0)
    hh_ref[:, 0:Cbp] = h

    # top c rows: the x[t-c] tap lives in the previous tile (left halo),
    # reuse p0[0:c] and issue a single small gated halo matmul.
    @pl.when(ti > 0)
    def _():
        xpl = xph_ref[0][8 - c:8, :]                    # last c halo frames
        halo = jnp.dot(xpl, wf_ref[:, Cbp:],
                       preferred_element_type=jnp.float32)
        hh_ref[0:c, 0:Cbp] = p0[0:c, :] + halo

    # ---- hs[t] = h[t+c] (0 for t+c >= T), written into lanes [Cbp, 2*Cbp) ----
    hs_mid = pltpu.roll(h, shift=tT - c, axis=0)        # row r <- h[(r+c) % tT]
    valid = (row < (tT - c)) & ((t0 + row + c) < T)
    hh_ref[:, Cbp:] = jnp.where(valid, hs_mid, 0.0)

    # bottom c rows: h[t0+tT+j] = x[t0+tT+j-c]@Wfl + x[t0+tT+j]@Wf0
    #                           = pfl[tT-c+j] (= pfl_s[j]) + xnh[j]@Wf0
    @pl.when(t0 + tT < T)
    def _():
        jj = jax.lax.broadcasted_iota(jnp.int32, (c, 1), 0)
        xnr = xnh_ref[0][0:c, :]                        # first c halo frames
        h_next = pfl_s[0:c, :] + jnp.dot(xnr, wf_ref[:, 0:Cbp],
                                         preferred_element_type=jnp.float32)
        hh_ref[tT - c:tT, Cbp:] = jnp.where(t0 + tT + jj < T, h_next, 0.0)

    # ---- affine, fused taps: y = [h | hs] @ [Wa0 ; War]  (one MXU pass) ----
    y = jnp.dot(hh_ref[...].astype(jnp.bfloat16), wa_ref[...],
                preferred_element_type=jnp.float32)

    # ---- single epilogue + single lane-dense store ----
    y = jnp.maximum(y + bias, 0.0) * scale + shift      # bias -> ReLU -> BN
    if bypass_scale != 0.0:
        y = y + bypass_scale * x_cur.astype(jnp.float32)
    o_ref[0] = y.astype(o_ref.dtype)


def _ftdnn_kernel_noctx(xc_ref, wf_ref, wa_ref, bsb_ref, o_ref, *,
                        bypass_scale):
    """context_size == 0: plain 1x1 factorized affine, no halos, no scratch."""
    x_cur = xc_ref[0]
    bias = bsb_ref[0:1, :]
    scale = bsb_ref[1:2, :]
    shift = bsb_ref[2:3, :]
    h = jnp.dot(x_cur, wf_ref[...], preferred_element_type=jnp.float32)
    y = jnp.dot(h.astype(jnp.bfloat16), wa_ref[...],
                preferred_element_type=jnp.float32)
    y = jnp.maximum(y + bias, 0.0) * scale + shift
    if bypass_scale != 0.0:
        y = y + bypass_scale * x_cur.astype(jnp.float32)
    o_ref[0] = y.astype(o_ref.dtype)


def _round_up(v, m):
    return -(-v // m) * m


def ftdnn_block_forward_btc(x_btc, params, *, context_size, bypass_scale,
                            tile_t=512, out_dtype=jnp.bfloat16):
    """Channel-last forward: x_btc (B, T, Cin) -> (B, T, Cout) in out_dtype.

    Chained FTDNN blocks should stay in this (B, T, C) layout between calls so
    no per-block transposes hit HBM.
    """
    c = int(context_size)
    assert 0 <= c <= 8, "context_size > 8 not supported by the 8-row halo"
    B, T, Cin = x_btc.shape
    Cb = params["wf0"].shape[1]
    Cout = params["wa0"].shape[1]
    assert Cout == Cin, "bypass residual requires output_dim == input_dim"

    # lane/sublane friendly sizes
    Cp = _round_up(Cin, 128)
    Cbp = _round_up(Cb, 128)
    Coutp = _round_up(Cout, 128)
    assert Cp == Coutp
    tT = min(int(tile_t), _round_up(T, 16))
    tT = max(_round_up(tT, 16), 16)
    assert tT >= 2 * c
    Tr = _round_up(T, tT)
    nT = Tr // tT
    kblk = tT // 8                   # halo-block index scale (8-row blocks)
    nblk = Tr // 8

    # boundary glue: pad T to a tile multiple, channels to 128, cast to bf16
    x = jnp.pad(x_btc, ((0, 0), (0, Tr - T), (0, Cp - Cin))).astype(jnp.bfloat16)

    def padw(w, r, k):
        return jnp.pad(w, ((0, r - w.shape[0]),
                           (0, k - w.shape[1]))).astype(jnp.bfloat16)

    wf0 = padw(params["wf0"], Cp, Cbp)
    wa0 = padw(params["wa0"], Cbp, Coutp)
    if c > 0:
        wfl = padw(params["wfl"], Cp, Cbp)
        war = padw(params["war"], Cbp, Coutp)
        wf = jnp.concatenate([wf0, wfl], axis=1)        # (Cp, 2*Cbp)
        wa = jnp.concatenate([wa0, war], axis=0)        # (2*Cbp, Coutp)
    else:
        wf, wa = wf0, wa0

    # fold eval-mode BatchNorm into scale/shift; pack bias/scale/shift together
    eps = 1e-5
    bn_scale = params["gamma"] / jnp.sqrt(params["var"] + eps)
    bn_shift = params["beta"] - params["mean"] * bn_scale
    bsb = jnp.zeros((8, Coutp), jnp.float32)
    bsb = bsb.at[0, :Cout].set(params["bias"].astype(jnp.float32))
    bsb = bsb.at[1, :Cout].set(bn_scale.astype(jnp.float32))
    bsb = bsb.at[2, :Cout].set(bn_shift.astype(jnp.float32))

    x_tile_spec = pl.BlockSpec((1, tT, Cp), lambda b, t: (b, t, 0))
    wf_spec = pl.BlockSpec(wf.shape, lambda b, t: (0, 0))
    wa_spec = pl.BlockSpec(wa.shape, lambda b, t: (0, 0))
    bsb_spec = pl.BlockSpec((8, Coutp), lambda b, t: (0, 0))
    out_spec = pl.BlockSpec((1, tT, Coutp), lambda b, t: (b, t, 0))

    if c > 0:
        halo_l = pl.BlockSpec(
            (1, 8, Cp), lambda b, t: (b, jnp.maximum(t * kblk - 1, 0), 0))
        halo_r = pl.BlockSpec(
            (1, 8, Cp), lambda b, t: (b, jnp.minimum((t + 1) * kblk, nblk - 1), 0))
        in_specs = [x_tile_spec, halo_l, halo_r, wf_spec, wa_spec, bsb_spec]
        operands = (x, x, x, wf, wa, bsb)
        scratch = [pltpu.VMEM((tT, 2 * Cbp), jnp.float32)]
        kernel = functools.partial(_ftdnn_kernel_ctx, tT=tT, c=c, Cbp=Cbp, T=T,
                                   bypass_scale=float(bypass_scale))
    else:
        in_specs = [x_tile_spec, wf_spec, wa_spec, bsb_spec]
        operands = (x, wf, wa, bsb)
        scratch = []
        kernel = functools.partial(_ftdnn_kernel_noctx,
                                   bypass_scale=float(bypass_scale))

    # VMEM budget derived from the actual (double-buffered) buffers, v7x-safe cap
    out_bytes = np.dtype(out_dtype).itemsize
    vmem_est = 2 * tT * Cp * 2 + 2 * tT * Coutp * out_bytes
    vmem_est += 2 * (wf.size + wa.size) * 2 + 2 * 8 * Coutp * 4
    if c > 0:
        vmem_est += 2 * 2 * 8 * Cp * 2 + tT * 2 * Cbp * 4
    vmem_limit = int(min(max(2 * vmem_est + (4 << 20), 32 << 20), 64 << 20))

    out = pl.pallas_call(
        kernel,
        out_shape=jax.ShapeDtypeStruct((B, Tr, Coutp), out_dtype),
        grid=(B, nT),
        in_specs=in_specs,
        out_specs=out_spec,
        scratch_shapes=scratch,
        compiler_params=pltpu.CompilerParams(
            dimension_semantics=("parallel", "parallel"),
            vmem_limit_bytes=vmem_limit),
    )(*operands)

    return out[:, :T, :Cout]


def ftdnn_block_forward(x_bct, params, *, context_size, bypass_scale,
                        tile_t=512, out_dtype=jnp.bfloat16):
    """PyTorch-layout wrapper: x_bct (B, input_dim, T) -> (B, output_dim, T)."""
    x = jnp.transpose(x_bct, (0, 2, 1))
    out = ftdnn_block_forward_btc(x, params, context_size=context_size,
                                  bypass_scale=bypass_scale, tile_t=tile_t,
                                  out_dtype=out_dtype)
    return jnp.transpose(out, (0, 2, 1))


def _reference(x_bct, params, *, context_size, bypass_scale):
    """Pure-JAX f32 reference of the same forward pass (for verification)."""
    c = context_size
    x = jnp.transpose(x_bct, (0, 2, 1)).astype(jnp.float32)
    B, T, Cin = x.shape
    h = x @ params["wf0"]
    if c > 0:
        xl = jnp.pad(x, ((0, 0), (c, 0), (0, 0)))[:, :T, :]
        h = h + xl @ params["wfl"]
    y = h @ params["wa0"]
    if c > 0:
        hr = jnp.pad(h, ((0, 0), (0, c), (0, 0)))[:, c:, :]
        y = y + hr @ params["war"]
    y = y + params["bias"]
    y = jnp.maximum(y, 0.0)
    eps = 1e-5
    y = params["gamma"] * (y - params["mean"]) / jnp.sqrt(params["var"] + eps) \
        + params["beta"]
    y = y + bypass_scale * x
    return jnp.transpose(y, (0, 2, 1))


if __name__ == "__main__":
    # small shapes consistent with the module: (B, input_dim, T)
    B, input_dim, bottleneck_dim, T = 2, 32, 16, 37
    output_dim = input_dim          # required for the bypass add
    context_size = 2
    bypass_scale = 0.66

    key = jax.random.PRNGKey(0)
    ks = jax.random.split(key, 10)
    x = jax.random.normal(ks[0], (B, input_dim, T), jnp.float32)

    # deterministic parameter init (only the non-masked taps of each TdnnAffine)
    params = {
        "wfl": 0.1 * jax.random.normal(ks[1], (input_dim, bottleneck_dim), jnp.float32),
        "wf0": 0.1 * jax.random.normal(ks[2], (input_dim, bottleneck_dim), jnp.float32),
        "wa0": 0.1 * jax.random.normal(ks[3], (bottleneck_dim, output_dim), jnp.float32),
        "war": 0.1 * jax.random.normal(ks[4], (bottleneck_dim, output_dim), jnp.float32),
        "bias": 0.1 * jax.random.normal(ks[5], (output_dim,), jnp.float32),
        # BatchNorm1d (eval mode) parameters / running stats
        "gamma": 1.0 + 0.1 * jax.random.normal(ks[6], (output_dim,), jnp.float32),
        "beta": 0.1 * jax.random.normal(ks[7], (output_dim,), jnp.float32),
        "mean": 0.1 * jax.random.normal(ks[8], (output_dim,), jnp.float32),
        "var": 0.5 + jax.random.uniform(ks[9], (output_dim,), jnp.float32),
    }
    # TODO(synk): step_semi_orth / training-mode BN stat updates are training
    # utilities, not part of the eval forward hot path, and are not implemented.

    ref = _reference(x, params, context_size=context_size,
                     bypass_scale=bypass_scale)

    def check(out, ref):
        out = np.asarray(out.astype(jnp.float32))
        np.testing.assert_allclose(out, np.asarray(ref), atol=3e-2, rtol=3e-2)

    # multi-tile path (tT=16 -> 3 time tiles, exercises both halo patches + pad)
    out_tiled = ftdnn_block_forward(x, params, context_size=context_size,
                                    bypass_scale=bypass_scale, tile_t=16)
    out_tiled = jax.block_until_ready(out_tiled)
    check(out_tiled, ref)

    # default tile size (single tile, exercises the right-pad / mask path)
    out_full = ftdnn_block_forward(x, params, context_size=context_size,
                                   bypass_scale=bypass_scale)
    out_full = jax.block_until_ready(out_full)
    check(out_full, ref)

    # context_size == 0 path (no halos, no scratch)
    ref0 = _reference(x, params, context_size=0, bypass_scale=bypass_scale)
    out0 = ftdnn_block_forward(x, params, context_size=0,
                               bypass_scale=bypass_scale)
    out0 = jax.block_until_ready(out0)
    check(out0, ref0)

    print("KERNEL_OK")
</pallas_src>

<mosaic_0001>
module attributes {stable_mosaic.version = 11 : i64} {
  func.func @_ftdnn_kernel_ctx(%arg0: i32, %arg1: i32, %arg2: memref<1x16x128xbf16, #tpu.memory_space<vmem>>, %arg3: memref<1x8x128xbf16, #tpu.memory_space<vmem>>, %arg4: memref<1x8x128xbf16, #tpu.memory_space<vmem>>, %arg5: memref<128x256xbf16, #tpu.memory_space<vmem>>, %arg6: memref<256x128xbf16, #tpu.memory_space<vmem>>, %arg7: memref<8x128xf32, #tpu.memory_space<vmem>>, %arg8: memref<1x16x128xbf16, #tpu.memory_space<vmem>>, %arg9: memref<16x256xf32, #tpu.memory_space<vmem>>) attributes {dimension_semantics = [#tpu.dimension_semantics<parallel>, #tpu.dimension_semantics<parallel>], iteration_bounds = array<i64: 2, 3>, scalar_prefetch = 0 : i64, scratch_operands = 1 : i64, tpu.core_type = #tpu.core_type<tc>, window_params = [{transform_indices = @transform_0, window_bounds = array<i64: 1, 16, 128>}, {transform_indices = @transform_1, window_bounds = array<i64: 1, 8, 128>}, {transform_indices = @transform_2, window_bounds = array<i64: 1, 8, 128>}, {pipeline_mode = #tpu.pipeline_mode<synchronous>, transform_indices = @transform_3, window_bounds = array<i64: 128, 256>}, {pipeline_mode = #tpu.pipeline_mode<synchronous>, transform_indices = @transform_4, window_bounds = array<i64: 256, 128>}, {pipeline_mode = #tpu.pipeline_mode<synchronous>, transform_indices = @transform_5, window_bounds = array<i64: 8, 128>}, {transform_indices = @transform_6, window_bounds = array<i64: 1, 16, 128>}]} {
    %c16_i32 = arith.constant 16 : i32
    %0 = arith.muli %arg1, %c16_i32 : i32
    %c0 = arith.constant 0 : index
    %c0_0 = arith.constant 0 : index
    %c0_1 = arith.constant 0 : index
    %1 = vector.load %arg2[%c0, %c0_0, %c0_1] : memref<1x16x128xbf16, #tpu.memory_space<vmem>>, vector<1x16x128xbf16>
    %2 = vector.shape_cast %1 : vector<1x16x128xbf16> to vector<16x128xbf16>
    %c0_2 = arith.constant 0 : index
    %c0_3 = arith.constant 0 : index
    %3 = vector.load %arg7[%c0_2, %c0_3] : memref<8x128xf32, #tpu.memory_space<vmem>>, vector<1x128xf32>
    %c1 = arith.constant 1 : index
    %c0_4 = arith.constant 0 : index
    %4 = vector.load %arg7[%c1, %c0_4] : memref<8x128xf32, #tpu.memory_space<vmem>>, vector<1x128xf32>
    %c2 = arith.constant 2 : index
    %c0_5 = arith.constant 0 : index
    %5 = vector.load %arg7[%c2, %c0_5] : memref<8x128xf32, #tpu.memory_space<vmem>>, vector<1x128xf32>
    %c0_6 = arith.constant 0 : index
    %c0_7 = arith.constant 0 : index
    %6 = vector.load %arg5[%c0_6, %c0_7] : memref<128x256xbf16, #tpu.memory_space<vmem>>, vector<128x256xbf16>
    %cst = arith.constant dense<0.000000e+00> : vector<16x256xf32>
    %7 = tpu.matmul %2, %6, %cst {dimension_numbers = #tpu.dot_dimension_numbers<[1], [0], [0], [1], [0, 0, 1, 1], [], []>} : vector<16x128xbf16>, vector<128x256xbf16>, vector<16x256xf32> -> vector<16x256xf32>
    %8 = vector.extract_strided_slice %7 {offsets = [0, 0], sizes = [16, 128], strides = [1, 1]} : vector<16x256xf32> to vector<16x128xf32>
    %9 = vector.extract_strided_slice %7 {offsets = [0, 128], sizes = [16, 128], strides = [1, 1]} : vector<16x256xf32> to vector<16x128xf32>
    %10 = tpu.iota {dimensions = array<i32: 0>} : vector<16x1xi32>
    %c2_i32 = arith.constant 2 : i32
    %11 = tpu.dynamic_rotate %9 by %c2_i32 dim 0 : vector<16x128xf32>, i32 -> vector<16x128xf32>
    %c2_i32_8 = arith.constant 2 : i32
    %12 = vector.broadcast %c2_i32_8 : i32 to vector<16x1xi32>
    %13 = arith.cmpi sge, %10, %12 : vector<16x1xi32>
    %cst_9 = arith.constant 0.000000e+00 : f32
    %14 = vector.shape_cast %13 : vector<16x1xi1> to vector<16x1xi1>
    %15 = vector.broadcast %14 : vector<16x1xi1> to vector<16x128xi1>
    %16 = vector.broadcast %cst_9 : f32 to vector<16x128xf32>
    %17 = arith.select %15, %11, %16 : vector<16x128xi1>, vector<16x128xf32>
    %18 = arith.addf %8, %17 : vector<16x128xf32>
    %c0_10 = arith.constant 0 : index
    %c0_11 = arith.constant 0 : index
    %19 = vector.load %arg9[%c0_10, %c0_11] : memref<16x256xf32, #tpu.memory_space<vmem>>, vector<16x128xf32>
    tpu.vector_store %arg9[%c0_10, %c0_11], %18 {strides = array<i32>} : memref<16x256xf32, #tpu.memory_space<vmem>>, vector<16x128xf32>,
    %c0_i32 = arith.constant 0 : i32
    %20 = arith.cmpi sgt, %arg1, %c0_i32 : i32
    %21 = arith.extui %20 : i1 to i32
    %c0_i32_12 = arith.constant 0 : i32
    %22 = arith.cmpi ne, %21, %c0_i32_12 : i32
    scf.if %22 {
      %c0_30 = arith.constant 0 : index
      %c0_31 = arith.constant 0 : index
      %c0_32 = arith.constant 0 : index
      %62 = vector.load %arg3[%c0_30, %c0_31, %c0_32] : memref<1x8x128xbf16, #tpu.memory_space<vmem>>, vector<1x8x128xbf16>
      %63 = vector.shape_cast %62 : vector<1x8x128xbf16> to vector<8x128xbf16>
      %64 = vector.extract_strided_slice %63 {offsets = [6, 0], sizes = [2, 128], strides = [1, 1]} : vector<8x128xbf16> to vector<2x128xbf16>
      %c0_33 = arith.constant 0 : index
      %c128_34 = arith.constant 128 : index
      %65 = vector.load %arg5[%c0_33, %c128_34] : memref<128x256xbf16, #tpu.memory_space<vmem>>, vector<128x128xbf16>
      %cst_35 = arith.constant dense<0.000000e+00> : vector<2x128xf32>
      %66 = tpu.matmul %64, %65, %cst_35 {dimension_numbers = #tpu.dot_dimension_numbers<[1], [0], [0], [1], [0, 0, 1, 1], [], []>} : vector<2x128xbf16>, vector<128x128xbf16>, vector<2x128xf32> -> vector<2x128xf32>
      %67 = vector.extract_strided_slice %8 {offsets = [0, 0], sizes = [2, 128], strides = [1, 1]} : vector<16x128xf32> to vector<2x128xf32>
      %68 = arith.addf %67, %66 : vector<2x128xf32>
      %c0_36 = arith.constant 0 : index
      %c0_37 = arith.constant 0 : index
      %69 = vector.load %arg9[%c0_36, %c0_37] : memref<16x256xf32, #tpu.memory_space<vmem>>, vector<2x128xf32>
      tpu.vector_store %arg9[%c0_36, %c0_37], %68 {strides = array<i32>} : memref<16x256xf32, #tpu.memory_space<vmem>>, vector<2x128xf32>,
    } else {
    }
    %c14_i32 = arith.constant 14 : i32
    %23 = tpu.dynamic_rotate %18 by %c14_i32 dim 0 : vector<16x128xf32>, i32 -> vector<16x128xf32>
    %c14_i32_13 = arith.constant 14 : i32
    %24 = vector.broadcast %c14_i32_13 : i32 to vector<16x1xi32>
    %25 = arith.cmpi slt, %10, %24 : vector<16x1xi32>
    %26 = vector.broadcast %0 : i32 to vector<16x1xi32>
    %27 = arith.addi %26, %10 : vector<16x1xi32>
    %c2_i32_14 = arith.constant 2 : i32
    %28 = vector.broadcast %c2_i32_14 : i32 to vector<16x1xi32>
    %29 = arith.addi %27, %28 : vector<16x1xi32>
    %c37_i32 = arith.constant 37 : i32
    %30 = vector.broadcast %c37_i32 : i32 to vector<16x1xi32>
    %31 = arith.cmpi slt, %29, %30 : vector<16x1xi32>
    %32 = arith.andi %25, %31 : vector<16x1xi1>
    %cst_15 = arith.constant 0.000000e+00 : f32
    %33 = vector.shape_cast %32 : vector<16x1xi1> to vector<16x1xi1>
    %34 = vector.broadcast %33 : vector<16x1xi1> to vector<16x128xi1>
    %35 = vector.broadcast %cst_15 : f32 to vector<16x128xf32>
    %36 = arith.select %34, %23, %35 : vector<16x128xi1>, vector<16x128xf32>
    %c0_16 = arith.constant 0 : index
    %c128 = arith.constant 128 : index
    %37 = vector.load %arg9[%c0_16, %c128] : memref<16x256xf32, #tpu.memory_space<vmem>>, vector<16x128xf32>
    tpu.vector_store %arg9[%c0_16, %c128], %36 {strides = array<i32>} : memref<16x256xf32, #tpu.memory_space<vmem>>, vector<16x128xf32>,
    %c16_i32_17 = arith.constant 16 : i32
    %38 = arith.addi %0, %c16_i32_17 : i32
    %c37_i32_18 = arith.constant 37 : i32
    %39 = arith.cmpi slt, %38, %c37_i32_18 : i32
    %40 = arith.extui %39 : i1 to i32
    %c0_i32_19 = arith.constant 0 : i32
    %41 = arith.cmpi ne, %40, %c0_i32_19 : i32
    scf.if %41 {
      %62 = tpu.iota {dimensions = array<i32: 0>} : vector<2x1xi32>
      %c0_30 = arith.constant 0 : index
      %c0_31 = arith.constant 0 : index
      %c0_32 = arith.constant 0 : index
      %63 = vector.load %arg4[%c0_30, %c0_31, %c0_32] : memref<1x8x128xbf16, #tpu.memory_space<vmem>>, vector<1x8x128xbf16>
      %64 = vector.shape_cast %63 : vector<1x8x128xbf16> to vector<8x128xbf16>
      %65 = vector.extract_strided_slice %64 {offsets = [0, 0], sizes = [2, 128], strides = [1, 1]} : vector<8x128xbf16> to vector<2x128xbf16>
      %66 = vector.extract_strided_slice %11 {offsets = [0, 0], sizes = [2, 128], strides = [1, 1]} : vector<16x128xf32> to vector<2x128xf32>
      %c0_33 = arith.constant 0 : index
      %c0_34 = arith.constant 0 : index
      %67 = vector.load %arg5[%c0_33, %c0_34] : memref<128x256xbf16, #tpu.memory_space<vmem>>, vector<128x128xbf16>
      %cst_35 = arith.constant dense<0.000000e+00> : vector<2x128xf32>
      %68 = tpu.matmul %65, %67, %cst_35 {dimension_numbers = #tpu.dot_dimension_numbers<[1], [0], [0], [1], [0, 0, 1, 1], [], []>} : vector<2x128xbf16>, vector<128x128xbf16>, vector<2x128xf32> -> vector<2x128xf32>
      %69 = arith.addf %66, %68 : vector<2x128xf32>
      %c16_i32_36 = arith.constant 16 : i32
      %70 = arith.addi %0, %c16_i32_36 : i32
      %71 = vector.broadcast %70 : i32 to vector<2x1xi32>
      %72 = arith.addi %71, %62 : vector<2x1xi32>
      %c37_i32_37 = arith.constant 37 : i32
      %73 = vector.broadcast %c37_i32_37 : i32 to vector<2x1xi32>
      %74 = arith.cmpi slt, %72, %73 : vector<2x1xi32>
      %cst_38 = arith.constant 0.000000e+00 : f32
      %75 = vector.shape_cast %74 : vector<2x1xi1> to vector<2x1xi1>
      %76 = vector.broadcast %75 : vector<2x1xi1> to vector<2x128xi1>
      %77 = vector.broadcast %cst_38 : f32 to vector<2x128xf32>
      %78 = arith.select %76, %69, %77 : vector<2x128xi1>, vector<2x128xf32>
      %c14 = arith.constant 14 : index
      %c128_39 = arith.constant 128 : index
      %79 = vector.load %arg9[%c14, %c128_39] : memref<16x256xf32, #tpu.memory_space<vmem>>, vector<2x128xf32>
      tpu.vector_store %arg9[%c14, %c128_39], %78 {strides = array<i32>} : memref<16x256xf32, #tpu.memory_space<vmem>>, vector<2x128xf32>,
    } else {
    }
    %c0_20 = arith.constant 0 : index
    %c0_21 = arith.constant 0 : index
    %42 = vector.load %arg9[%c0_20, %c0_21] : memref<16x256xf32, #tpu.memory_space<vmem>>, vector<16x256xf32>
    %43 = arith.truncf %42 : vector<16x256xf32> to vector<16x256xbf16>
    %c0_22 = arith.constant 0 : index
    %c0_23 = arith.constant 0 : index
    %44 = vector.load %arg6[%c0_22, %c0_23] : memref<256x128xbf16, #tpu.memory_space<vmem>>, vector<256x128xbf16>
    %cst_24 = arith.constant dense<0.000000e+00> : vector<16x128xf32>
    %45 = tpu.matmul %43, %44, %cst_24 {dimension_numbers = #tpu.dot_dimension_numbers<[1], [0], [0], [1], [0, 0, 1, 1], [], []>} : vector<16x256xbf16>, vector<256x128xbf16>, vector<16x128xf32> -> vector<16x128xf32>
    %46 = vector.broadcast %3 : vector<1x128xf32> to vector<16x128xf32>
    %47 = arith.addf %45, %46 : vector<16x128xf32>
    %cst_25 = arith.constant 0.000000e+00 : f32
    %48 = vector.broadcast %cst_25 : f32 to vector<16x128xf32>
    %49 = arith.maximumf %47, %48 : vector<16x128xf32>
    %50 = vector.broadcast %4 : vector<1x128xf32> to vector<16x128xf32>
    %51 = arith.mulf %49, %50 : vector<16x128xf32>
    %52 = vector.broadcast %5 : vector<1x128xf32> to vector<16x128xf32>
    %53 = arith.addf %51, %52 : vector<16x128xf32>
    %54 = arith.extf %2 : vector<16x128xbf16> to vector<16x128xf32>
    %cst_26 = arith.constant 6.600000e-01 : f32
    %55 = vector.broadcast %cst_26 : f32 to vector<16x128xf32>
    %56 = arith.mulf %55, %54 : vector<16x128xf32>
    %57 = arith.addf %53, %56 : vector<16x128xf32>
    %58 = arith.truncf %57 : vector<16x128xf32> to vector<16x128xbf16>
    %c0_27 = arith.constant 0 : index
    %c0_28 = arith.constant 0 : index
    %c0_29 = arith.constant 0 : index
    %59 = vector.load %arg8[%c0_27, %c0_28, %c0_29] : memref<1x16x128xbf16, #tpu.memory_space<vmem>>, vector<1x16x128xbf16>
    %60 = vector.shape_cast %59 : vector<1x16x128xbf16> to vector<16x128xbf16>
    %61 = vector.shape_cast %58 : vector<16x128xbf16> to vector<1x16x128xbf16>
    tpu.vector_store %arg8[%c0_27, %c0_28, %c0_29], %61 {strides = array<i32>} : memref<1x16x128xbf16, #tpu.memory_space<vmem>>, vector<1x16x128xbf16>,
    return
  }
  func.func @transform_0(%arg0: i32, %arg1: i32) -> (i32, i32, i32) {
    %c0_i32 = arith.constant 0 : i32
    %c0_i32_0 = arith.constant 0 : i32
    return %arg0, %arg1, %c0_i32 : i32, i32, i32
  }
  func.func @transform_1(%arg0: i32, %arg1: i32) -> (i32, i32, i32) {
    %c2_i32 = arith.constant 2 : i32
    %0 = arith.muli %arg1, %c2_i32 : i32
    %c1_i32 = arith.constant 1 : i32
    %1 = arith.subi %0, %c1_i32 : i32
    %c0_i32 = arith.constant 0 : i32
    %2 = arith.maxsi %1, %c0_i32 : i32
    %c0_i32_0 = arith.constant 0 : i32
    %c0_i32_1 = arith.constant 0 : i32
    return %arg0, %2, %c0_i32_0 : i32, i32, i32
  }
  func.func @transform_2(%arg0: i32, %arg1: i32) -> (i32, i32, i32) {
    %c1_i32 = arith.constant 1 : i32
    %0 = arith.addi %arg1, %c1_i32 : i32
    %c2_i32 = arith.constant 2 : i32
    %1 = arith.muli %0, %c2_i32 : i32
    %c5_i32 = arith.constant 5 : i32
    %2 = arith.minsi %1, %c5_i32 : i32
    %c0_i32 = arith.constant 0 : i32
    %c0_i32_0 = arith.constant 0 : i32
    return %arg0, %2, %c0_i32 : i32, i32, i32
  }
  func.func @transform_3(%arg0: i32, %arg1: i32) -> (i32, i32) {
    %c0_i32 = arith.constant 0 : i32
    %c0_i32_0 = arith.constant 0 : i32
    %c0_i32_1 = arith.constant 0 : i32
    return %c0_i32, %c0_i32_0 : i32, i32
  }
  func.func @transform_4(%arg0: i32, %arg1: i32) -> (i32, i32) {
    %c0_i32 = arith.constant 0 : i32
    %c0_i32_0 = arith.constant 0 : i32
    %c0_i32_1 = arith.constant 0 : i32
    return %c0_i32, %c0_i32_0 : i32, i32
  }
  func.func @transform_5(%arg0: i32, %arg1: i32) -> (i32, i32) {
    %c0_i32 = arith.constant 0 : i32
    %c0_i32_0 = arith.constant 0 : i32
    %c0_i32_1 = arith.constant 0 : i32
    return %c0_i32, %c0_i32_0 : i32, i32
  }
  func.func @transform_6(%arg0: i32, %arg1: i32) -> (i32, i32, i32) {
    %c0_i32 = arith.constant 0 : i32
    %c0_i32_0 = arith.constant 0 : i32
    return %arg0, %arg1, %c0_i32 : i32, i32, i32
  }
}

</mosaic_0001>

<bundles_post_ra>
// kernel: tpu_custom_call.1
= control target key start
LH: loop header
LB: loop body
LE: loop exit
PB: predicated region body
PF: predicated region fallthrough
CT: control target
= control target key end

     0   :  { %s2452_s0 = inlined_call_operand.hbm [shape: bf16[2,48,128], index: 0, kind: input, shape index: {}]   ;;  %s2453_s1 = inlined_call_operand.hbm [shape: bf16[2,48,128], index: 1, kind: input, shape index: {}]   ;;  %s2454_s2 = inlined_call_operand.hbm [shape: bf16[2,48,128], index: 2, kind: input, shape index: {}]   ;;  %s2455_s3 = inlined_call_operand.hbm [shape: bf16[128,256], index: 3, kind: input, shape index: {}]   ;;  %s2456_s4 = inlined_call_operand.hbm [shape: bf16[256,128], index: 4, kind: input, shape index: {}]   ;;  %s2457_s5 = inlined_call_operand.hbm [shape: f32[8,128], index: 5, kind: input, shape index: {}]   ;;  %s2458_s6 = inlined_call_operand.hbm [shape: bf16[2,48,128], index: 6, kind: output, shape index: {}]  }
   0x1   :  { %2476 = sst [smem:[#allocation35_spill]] %s2452_s0 }
   0x2   :  { %2477 = sst [smem:[#allocation36_spill]] %s2453_s1 }
   0x3   :  { %2478 = sst [smem:[#allocation37_spill]] %s2454_s2 }
   0x4   :  { %2479 = sst [smem:[#allocation38_spill]] %s2455_s3 }
   0x5   :  { %2480 = sst [smem:[#allocation39_spill]] %s2456_s4 }
   0x6   :  { %2481 = sst [smem:[#allocation40_spill]] %s2457_s5 }
   0x7   :  { %2482 = sst [smem:[#allocation41_spill]] %s2458_s6 }
   0x8   :  { %11 = vsyncpa [#allocation4], 0 }
   0x9   :  { %13 = vsyncpa [#allocation4 + $0x1], 0 }
   0xa   :  { %14 = vsyncpa [#allocation7], 0 }
   0xb   :  { %16 = vsyncpa [#allocation7 + $0x1], 0 }
   0xc   :  { %17 = vsyncpa [#allocation10], 0 }
   0xd   :  { %18 = vsyncpa [#allocation13], 0 }
   0xe   :  { %19 = vsyncpa [#allocation5], 0 }
   0xf   :  { %21 = vsyncpa [#allocation5 + $0x1], 0  ;;  %s2043_s21 = smov 0   ;;  %s2045_s22 = smov 0  }
  0x10   :  { %s2047_s23 = smov 0   ;;  %s2049_s24 = smov 0  }
  0x11   :  { %s2051_s25 = smov 0   ;;  %s2053_s26 = smov 0  }
  0x12   :  { %s2055_s27 = smov 0   ;;  %s2057_s28 = smov 0  }
  0x13   :  { %s2059_s29 = smov 0   ;;  %s2061_s30 = smov 0  }
  0x14   :  { %s2063_s7 = smov 0   ;;  %s2065_s8 = smov 0  }
  0x15   :  { %s2067_s9 = smov 0   ;;  %s2069_s10 = smov 0  }
  0x16 LB: > { %2483 = sst [smem:[#allocation21_spill]] %s1945_s21  ;;  %s2114_s11 = sadd.s32 4294967295, %s1997_s10   ;;  %s1997_s10 = sphi %s2069_s10, %s27_s10   ;;  %s1993_s9 = sphi %s2067_s9, %s2545_s9   ;;  %s1989_s8 = sphi %s2065_s8, %s2544_s8   ;;  %s1985_s7 = sphi %s2063_s7, %s2534_s7   ;;  %s1981_s30 = sphi %s2061_s30, %s2533_s30   ;;  %s1977_s29 = sphi %s2059_s29, %s2543_s29   ;;  %s1973_s28 = sphi %s2057_s28, %s2542_s28   ;;  %s1969_s27 = sphi %s2055_s27, %s2541_s27   ;;  %s1965_s26 = sphi %s2053_s26, %s2540_s26   ;;  %s1961_s25 = sphi %s2051_s25, %s2539_s25   ;;  %s1957_s24 = sphi %s2049_s24, %s2530_s24   ;;  %s1953_s23 = sphi %s2047_s23, %s2538_s23   ;;  %s1949_s22 = sphi %s2045_s22, %s2537_s22   ;;  %s1945_s21 = sphi %s2043_s21, %s2529_s21  }
  0x17   : > { %2484 = sst [smem:[#allocation22_spill]] %s1949_s22  ;;  %p1191_p0 = scmp.ge.s32.totalorder %s1997_s10, 1 }
  0x18   : > { %2485 = sst [smem:[#allocation23_spill]] %s1961_s25  ;;  %p62_p1 = scmp.eq.s32.totalorder %s2114_s11, 0 }
  0x19   : > { %2486 = sst [smem:[#allocation24_spill]] %s1977_s29  ;;  %p235_p2 = scmp.lt.s32.totalorder %s1997_s10, 7 }
  0x1a   : > { %2487 = sst [smem:[#allocation25_spill]] %s1981_s30  ;;  %s1999_s16 = smov [#allocation9]  }
  0x1b   : > { %2488 = sst [smem:[#allocation26_spill]] %s1985_s7  ;;  %p2122_p3 = pnand %p1191_p0, %p235_p2 }
  0x1c   : > { %2489 = sst [smem:[#allocation27_spill]] %s1989_s8  ;;  %s248_s17 = sshll.u32 %s1999_s16, 4  ;;  %s249_s17 = int_to_ptr.vmem [resolvable:$true] %s248_s17 }
  0x1d   : > { %2490 = sst [smem:[#allocation28_spill]] %s1993_s9  ;;  %p1502_p4 = pneg %p2122_p3 }
  0x1e   : > { %s2491_s3 = sld [smem:[#allocation38_spill]]  ;;  %s2000_s19 = smov 128  }
  0x1f   : > { %s2492_s15 = scalar_select %p2122_p3, 1, 0 }
  0x20   : > { %p2130_p5 = pnand %p1502_p4, %p62_p1  ;;  %s2001_s20 = smov 8  }
  0x21   : > { %2493 = sst [smem:[#allocation29_spill]] %s2492_s15  ;;  %s36_s12 = sadd.s32 1, %s1989_s8 }
  0x22   : > { %p37_p6 = scmp.ge.s32.totalorder %s36_s12, 3  ;;  %s39_s13 = sadd.s32 1, %s1993_s9 }
  0x23   : > { %p56_p7 = scmp.eq.s32.totalorder %s1997_s10, 0  ;;  %p91_p12 = scmp.ne.s32.totalorder %s1965_s26, %s1961_s25 }
  0x24   : > { %s246_s14 = sshll.u32 %s2491_s3, 4  ;;  %s2140_s3 = sshll.u32 %s1989_s8, 1  ;;  %s247_s14 = int_to_ptr.hbm [resolvable:$true] %s246_s14 }
  0x25   : > { %1505 = dma.hbm_to_vmem [thread:$0]  (!%p2130_p5), %s247_s14, 2048, %s249_s17, [#allocation10], %s2000_s19, %s2000_s19, %s2001_s20  }
  0x26   : > { %s2547_s12 = smov (%p37_p6, %s36_s12), 0  ;;  %s2549_s13 = smov (!%p37_p6, %s39_s13), %s1993_s9 }
  0x27   : > { %2495 = sst [smem:[#allocation30_spill]] %s2547_s12  ;;  %s44_s16 = ssub.s32 %s1989_s8, %s2547_s12 }
  0x28   : > { %s1186_s14 = sadd.s32 4294967295, %s2140_s3  ;;  %p41_p8 = scmp.ge.s32.totalorder %s2549_s13, 2 }
  0x29   : > { %p73_p9 = scmp.gt.s32.totalorder %s1186_s14, 0  ;;  %s1187_s17 = sshll.u32 %s2547_s12, 1 }
  0x2a   : > { %s84_s19 = sadd.s32 1, %s1965_s26  ;;  %s2551_s13 = smov (%p41_p8, %s2549_s13), 0 }
  0x2b   : > { %2496 = sst [smem:[#allocation31_spill]] %s2551_s13  ;;  %s2553_s14 = smov (!%p73_p9, %s1186_s14), 0 }
  0x2c   : > { %s2154_s20 = ssub.s32 %s1993_s9, %s2551_s13  ;;  %s1188_s6 = sadd.s32 4294967295, %s1187_s17 }
  0x2d   : > { %2497 = sst [smem:[#allocation32_spill]] %s2154_s20  ;;  %s2157_s8 = sor.u32 %s44_s16, %s2154_s20 }
  0x2e   : > { %p77_p10 = scmp.gt.s32.totalorder %s1188_s6, 0  ;;  %p46_p11 = scmp.eq.s32.totalorder %s2157_s8, 0 }
  0x2f   : > { %p2164_p13 = por %p91_p12, %p56_p7  ;;  %p97_p0 = scmp.ne.s32.totalorder %s1961_s25, %s1957_s24 }
  0x30   : > { %s2555_s6 = smov (!%p77_p10, %s1188_s6), 0  ;;  %s2170_s7 = sadd.s32 2, %s1187_s17 }
  0x31   : > { %s80_s13 = ssub.s32 %s2553_s14, %s2555_s6  ;;  %p2175_p2 = por %p97_p0, %p62_p1 }
  0x32   : > { %s81_s30 = sor.u32 %s80_s13, %s2154_s20  ;;  %p113_p6 = scmp.lt.s32.totalorder %s2170_s7, 5 }
  0x33   : > { %s2499_s16 = scalar_select %p2175_p2, 1, 0 }
  0x34   : > { %p82_p4 = scmp.eq.s32.totalorder %s81_s30, 0  ;;  %p2475_p8 = scmp.lt.s32.totalorder %s1997_s10, 6 }
  0x35   : > { %2500 = sst [smem:[#allocation33_spill]] %s2499_s16  ;;  %s2182_s15 = smul.u32 6, %s1993_s9 }
  0x36   : > { %s2185_s2 = scalar_select %p82_p4, %s1965_s26, %s84_s19  }
  0x37   : > { %s312_s6 = sand.u32 1, %s1997_s10   ;;  %s314_s24 = sand.u32 1, %s1965_s26  }
  0x38   : > { %s1199_s17 = sshll.u32 %s314_s24, 2  ;;  %s324_s25 = sadd.s32 %s2182_s15, %s2553_s14 }
  0x39   : > { %s1202_s13 = sshll.u32 %s324_s25, 2  ;;  %s316_s20 = scalar_lea.vmem [#allocation6], %s1199_s17 }
  0x3a   : > { %s330_s21 = sshll.u32 %s316_s20, 4  ;;  %s2501_s1 = sld [smem:[#allocation36_spill]]  ;;  %s331_s21 = int_to_ptr.vmem [resolvable:$true] %s330_s21 }
  0x3b   : > { %p1516_p9 = pnand %p2475_p8, %p2164_p13  ;;  %s2502_s4 = sld [smem:[#allocation39_spill]] }
  0x3c   : > { %s2200_s25 = scalar_lea.sflag [#allocation7], %s312_s6  ;;  %s2002_s0 = smov [#allocation11]  }
  0x3d   : > { %s262_s22 = sshll.u32 %s2002_s0, 4  ;;  %s2503_s5 = sld [smem:[#allocation40_spill]]  ;;  %s263_s22 = int_to_ptr.vmem [resolvable:$true] %s262_s22 }
  0x3e   : > { %s2472_s20 = smov 64   ;;  %s1184_s17 = sadd.s32 4294967294, %s1997_s10  }
  0x3f   : > { %p55_p10 = scmp.ne.s32.totalorder %s1977_s29, %s1973_s28  ;;  %p61_p12 = scmp.ne.s32.totalorder %s1973_s28, %s1969_s27 }
  0x40   : > { %s326_s16 = scalar_lea.hbm %s2501_s1, %s1202_s13  ;;  %s48_s13 = sadd.s32 1, %s1977_s29 }
  0x41   : > { %s328_s30 = sshll.u32 %s326_s16, 4  ;;  %s260_s24 = sshll.u32 %s2502_s4, 4  ;;  %s329_s30 = int_to_ptr.hbm [resolvable:$true] %s328_s30  ;;  %s261_s24 = int_to_ptr.hbm [resolvable:$true] %s260_s24 }
  0x42   : > { %1518 = dma.hbm_to_vmem [thread:$0]  (!%p1516_p9), %s329_s30, 64, %s331_s21, %s2200_s25  }
  0x43   : > { %s275_s14 = sshll.u32 %s2503_s5, 4  ;;  %s2473_s16 = smov 4   ;;  %s276_s14 = int_to_ptr.hbm [resolvable:$true] %s275_s14 }
  0x44   : > { %1508 = dma.hbm_to_vmem [thread:$0]  (!%p2130_p5), %s261_s24, 2048, %s263_s22, [#allocation10], %s2472_s20, %s2472_s20, %s2473_s16  }
  0x45   : > { %s2005_s21 = smov [#allocation12]   ;;  %p222_p13 = scmp.eq.s32.totalorder %s2114_s11, 5 }
  0x46   : > { %s277_s6 = sshll.u32 %s2005_s21, 4  ;;  %p228_p0 = scmp.eq.s32.totalorder %s1184_s17, 5  ;;  %s278_s6 = int_to_ptr.vmem [resolvable:$true] %s277_s6 }
  0x47   : > { %1511 = dma.hbm_to_vmem [thread:$0]  (!%p2130_p5), %s276_s14, 128, %s278_s6, [#allocation13]  }
  0x48   : > { %s2218_s30 = scalar_select %p46_p11, %s1977_s29, %s48_s13  }
  0x49   : > { %p2227_p4 = por %p56_p7, %p55_p10  ;;  %p2233_p9 = por %p62_p1, %p61_p12 }
  0x4a   : > { %2504 = sst [smem:[#allocation34_spill]] %s2218_s30  ;;  %p2237_p5 = por %p222_p13, %p55_p10 }
  0x4b   : > { %p2241_p11 = por %p228_p0, %p61_p12  ;;  %s288_s0 = sand.u32 1, %s1977_s29  }
  0x4c   : > { %s297_s22 = sadd.s32 %s2182_s15, %s2140_s3  ;;  %s1196_s9 = sshll.u32 %s288_s0, 3 }
  0x4d   : > { %s2509_s12 = sld [smem:[#allocation22_spill]]  ;;  %s1198_s14 = sshll.u32 %s297_s22, 2 }
  0x4e   : > { %s2510_s17 = sld [smem:[#allocation35_spill]]  ;;  %s292_s16 = scalar_lea.vmem [#allocation3], %s1196_s9 }
  0x4f   : > { %s2511_s13 = sld [smem:[#allocation21_spill]]  ;;  %s302_s1 = sshll.u32 %s292_s16, 4  ;;  %s303_s1 = int_to_ptr.vmem [resolvable:$true] %s302_s1 }
  0x50   : > { %s2512_s4 = sld [smem:[#allocation32_spill]]  ;;  %p1513_p10 = pnand %p2475_p8, %p2227_p4 }
  0x51   : > { %s289_s30 = scalar_lea.sflag [#allocation4], %s288_s0  ;;  %s2513_s22 = smov 4  }
  0x52   : > { %s2514_s29 = smov 64   ;;  %s120_s9 = sadd.s32 1, %s1953_s23 }
  0x53   : > { %s2557_s7 = smov (!%p113_p6, %s2170_s7), 5  ;;  %p127_p13 = scmp.ne.s32.totalorder %s1953_s23, %s2509_s12 }
  0x54   : > { %s299_s20 = scalar_lea.hbm %s2510_s17, %s1198_s14  ;;  %s1419_s14 = sadd.s32 2, %s2140_s3 }
  0x55   : > { %s300_s5 = sshll.u32 %s299_s20, 4  ;;  %p109_p12 = scmp.lt.s32.totalorder %s1419_s14, 5  ;;  %s301_s5 = int_to_ptr.hbm [resolvable:$true] %s300_s5 }
  0x56   : > { %1515 = dma.hbm_to_vmem [thread:$0]  (!%p1513_p10), %s301_s5, 128, %s303_s1, %s289_s30, %s2514_s29, %s2514_s29, %s2513_s22  }
  0x57   : > { %s2559_s14 = smov (!%p109_p12, %s1419_s14), 5  ;;  %p133_p0 = scmp.ne.s32.totalorder %s2509_s12, %s2511_s13 }
  0x58   : > { %s116_s20 = ssub.s32 %s2559_s14, %s2557_s7  ;;  %s339_s16 = sand.u32 1, %s1953_s23  }
  0x59   : > { %s117_s19 = sor.u32 %s116_s20, %s2512_s4  ;;  %p2271_p4 = por %p127_p13, %p56_p7 }
  0x5a   : > { %p118_p10 = scmp.eq.s32.totalorder %s117_s19, 0  ;;  %p2277_p8 = por %p133_p0, %p62_p1 }
  0x5b   : > { %s1203_s3 = sshll.u32 %s339_s16, 2  ;;  %s349_s5 = sadd.s32 %s2182_s15, %s2559_s14 }
  0x5c   : > { %s2283_s29 = scalar_select %p118_p10, %s1953_s23, %s120_s9  }
  0x5d   : > { %s1205_s7 = sshll.u32 %s349_s5, 2  ;;  %s2517_s4 = sld [smem:[#allocation37_spill]] }
  0x5e   : > { %s341_s6 = scalar_lea.vmem [#allocation8], %s1203_s3  ;;  %p2518_p7 = scmp.lt.s32.totalorder %s1997_s10, 6 }
  0x5f   : > { %s355_s17 = sshll.u32 %s341_s6, 4  ;;  %s2296_s15 = sand.u32 (!%p2122_p3), 1, %s1973_s28   ;;  %s356_s17 = int_to_ptr.vmem [resolvable:$true] %s355_s17 }
  0x60   : > { %p1519_p6 = pnand %p2518_p7, %p2271_p4  ;;  %s1207_s14 = sshll.u32 (!%p2122_p3), %s2296_s15, 3 }
  0x61   : > { %364 = sbr.rel (%p2122_p3) target bundleno = 833 (0x341), region = 44  ;;  %s367_s9 = scalar_lea.sflag (!%p2122_p3), [#allocation4], %s2296_s15 }
  0x62   : > { %s2302_s20 = scalar_lea.vmem (!%p2122_p3), [#allocation3], %s1207_s14 }
  0x63   : > { %s351_s21 = scalar_lea.hbm %s2517_s4, %s1205_s7 }
  0x64   : > { %s353_s13 = sshll.u32 %s351_s21, 4  ;;  %s354_s13 = int_to_ptr.hbm [resolvable:$true] %s353_s13 }
  0x65   : > { %1521 = dma.hbm_to_vmem [thread:$0]  (!%p1519_p6), %s354_s13, 64, %s356_s17, %s2200_s25  }
  0x66   : > { %1920 = dma.done.wait (%p2233_p9), %s367_s9, 128  }
  0x67   : > { %1922 = vsyncadd (%p2233_p9), %s367_s9, 4294967168  ;;  %s2520_s25 = sld [smem:[#allocation23_spill]]  ;;  %s376_s19 = sand.u32 1, %s2114_s11  }
  0x68   : > { %s377_s5 = scalar_lea.sflag [#allocation7], %s376_s19 }
  0x6d   : > { %s378_s0 = sand.u32 1, %s2520_s25  }
  0x6e   : > { %s2310_s3 = sshll.u32 %s378_s0, 2 }
  0x6f   : > { %s380_s7 = scalar_lea.vmem [#allocation6], %s2310_s3 }
  0x70   : > { %1924 = dma.done.wait (%p2175_p2), %s377_s5, 64  }
  0x71   : > { %1926 = vsyncadd (%p2175_p2), %s377_s5, 4294967232  ;;  %s2522_s30 = sld [smem:[#allocation22_spill]] }
  0x77   : > { %s388_s12 = sand.u32 1, %s2522_s30  }
  0x78   : > { %s2318_s18 = sshll.u32 %s388_s12, 2 }
  0x79   : > { %s390_s4 = scalar_lea.vmem [#allocation8], %s2318_s18 }
  0x7a   : > { %1928 = dma.done.wait (%p2277_p8), %s377_s5, 64  }
  0x7b   : > { %1930 = vsyncadd (%p2277_p8), %s377_s5, 4294967232 }
  0x7c   : > { %1932 = dma.done.wait (%p62_p1), [#allocation10], 4096  }
  0x7d   : > { %1934 = vsyncadd (%p62_p1), [#allocation10], 4294963200 }
  0x7e   : > { %1936 = dma.done.wait (%p62_p1), [#allocation13], 128  }
  0x7f   : > { %1938 = vsyncadd (%p62_p1), [#allocation13], 4294967168  ;;  %s2523_s21 = sld [smem:[#allocation25_spill]]  ;;  %v2335_v0 = vld [vmem:[%s2302_s20] sm:$0xff]   ;;  %v1277_v4 = vld [vmem:[#allocation9 + $0x70] sm:$0xf]  ;;  %v591_v53 = vlaneseq }
  0x80   : > { %v2337_v1 = vld [vmem:[#allocation12] sm:$0x1]  ;;  %v2339_v2 = vld [vmem:[#allocation12 + $0x1] sm:$0x1]  ;;  %v2341_v3 = vld [vmem:[#allocation12 + $0x2] sm:$0x1] }
  0x81   : > { %v1440_v5 = vld [vmem:[#allocation9 + $0x74] sm:$0xf0]  ;;  %v1439_v7 = vld [vmem:[#allocation9 + $0x74] sm:$0xf]  ;;  %v1279_v8 = vld [vmem:[#allocation9 + $0x78] sm:$0xf0] }
  0x82   : > { %v1278_v6 = vor.u32 %v1440_v5, %v1277_v4  ;;  %v1269_v9 = vld [vmem:[#allocation9 + $0x60] sm:$0xf]  ;;  %v1282_v10 = vor.u32 %v1439_v7, %v1279_v8  ;;  %v1438_v11 = vld [vmem:[#allocation9 + $0x64] sm:$0xf0]  ;;  %v1437_v12 = vld [vmem:[#allocation9 + $0x64] sm:$0xf] }
  0x83   : > { %v1271_v13 = vld [vmem:[#allocation9 + $0x68] sm:$0xf0]  ;;  %v1270_v14 = vor.u32 %v1438_v11, %v1269_v9  ;;  %v1261_v16 = vld [vmem:[#allocation9 + $0x50] sm:$0xf]  ;;  %v1436_v17 = vld [vmem:[#allocation9 + $0x54] sm:$0xf0] }
  0x84   : > { %563 = vmatpush.bf16.msra.mxu0 %v1278_v6  ;;  %577 = vmatpush.bf16.msra.mxu1 %v1282_v10  ;;  %v1274_v15 = vor.u32 %v1437_v12, %v1271_v13  ;;  %v1435_v18 = vld [vmem:[#allocation9 + $0x54] sm:$0xf]  ;;  %v1263_v19 = vld [vmem:[#allocation9 + $0x58] sm:$0xf0]  ;;  %v1262_v20 = vor.u32 %v1436_v17, %v1261_v16  ;;  %v1253_v22 = vld [vmem:[#allocation9 + $0x40] sm:$0xf] }
  0x85   : > { %s1214_s6 = sshll.u32 %s2523_s21, 4  ;;  %v1266_v21 = vor.u32 %v1435_v18, %v1263_v19  ;;  %v1434_v23 = vld [vmem:[#allocation9 + $0x44] sm:$0xf0]  ;;  %v1433_v24 = vld [vmem:[#allocation9 + $0x44] sm:$0xf]  ;;  %v2344_v54 = vshrl.u32 %v591_v53, 7 }
  0x86   : > { %v1255_v25 = vld [vmem:[#allocation9 + $0x48] sm:$0xf0]  ;;  %v1254_v26 = vor.u32 %v1434_v23, %v1253_v22  ;;  %v1245_v28 = vld [vmem:[#allocation9 + $0x30] sm:$0xf]  ;;  %v1432_v29 = vld [vmem:[#allocation9 + $0x34] sm:$0xf0] }
  0x87   : > { %v1258_v27 = vor.u32 %v1433_v24, %v1255_v25  ;;  %v1431_v30 = vld [vmem:[#allocation9 + $0x34] sm:$0xf]  ;;  %v1247_v31 = vld [vmem:[#allocation9 + $0x38] sm:$0xf0]  ;;  %v1246_v32 = vor.u32 %v1432_v29, %v1245_v28  ;;  %v1237_v34 = vld [vmem:[#allocation9 + $0x20] sm:$0xf] }
  0x88   : > { %564 = vmatpush.bf16.msra.mxu0 %v1270_v14  ;;  %578 = vmatpush.bf16.msra.mxu1 %v1274_v15  ;;  %v1250_v33 = vor.u32 %v1431_v30, %v1247_v31  ;;  %v1430_v35 = vld [vmem:[#allocation9 + $0x24] sm:$0xf0]  ;;  %v1429_v36 = vld [vmem:[#allocation9 + $0x24] sm:$0xf]  ;;  %v1239_v37 = vld [vmem:[#allocation9 + $0x28] sm:$0xf0] }
  0x89   : > { %v1238_v38 = vor.u32 %v1430_v35, %v1237_v34  ;;  %v1242_v39 = vor.u32 %v1429_v36, %v1239_v37  ;;  %v1229_v40 = vld [vmem:[#allocation9 + $0x10] sm:$0xf]  ;;  %v1428_v41 = vld [vmem:[#allocation9 + $0x14] sm:$0xf0]  ;;  %v1427_v42 = vld [vmem:[#allocation9 + $0x14] sm:$0xf] }
  0x8a   : > { %v1231_v43 = vld [vmem:[#allocation9 + $0x18] sm:$0xf0]  ;;  %v1230_v44 = vor.u32 %v1428_v41, %v1229_v40  ;;  %v1221_v46 = vld [vmem:[#allocation9] sm:$0xf]  ;;  %v1426_v47 = vld [vmem:[#allocation9 + $0x4] sm:$0xf0] }
  0x8b   : > { %v1234_v45 = vor.u32 %v1427_v42, %v1231_v43  ;;  %v1425_v48 = vld [vmem:[#allocation9 + $0x4] sm:$0xf]  ;;  %v1223_v49 = vld [vmem:[#allocation9 + $0x8] sm:$0xf0]  ;;  %v1222_v50 = vor.u32 %v1426_v47, %v1221_v46  ;;  %v2347_v55 = vadd.s32 8, %v2344_v54  ;;  %vm596_vm0 = vcmp.lt.s32.totalorder %v2344_v54, 2 }
  0x8c   : > { %565 = vmatpush.bf16.msra.mxu0 %v1262_v20  ;;  %579 = vmatpush.bf16.msra.mxu1 %v1266_v21  ;;  %v1226_v51 = vor.u32 %v1425_v48, %v1223_v49  ;;  %v1424_v52 = vld [vmem:[%s2302_s20] sm:$0xff]  ;;  %vm599_vm1 = vcmp.ge.s32.totalorder %v2344_v54, 2  ;;  %s2356_s11 = scalar_lea.vmem [#allocation14], %s1207_s14  ;;  %p1283_p1 = scmp.le.s32.totalorder %s2523_s21, 0 }
  0x90   : > { %566 = vmatpush.bf16.msra.mxu0 %v1254_v26  ;;  %580 = vmatpush.bf16.msra.mxu1 %v1258_v27 }
  0x94   : > { %567 = vmatpush.bf16.msra.mxu0 %v1246_v32  ;;  %581 = vmatpush.bf16.msra.mxu1 %v1250_v33 }
  0x98   : > { %568 = vmatpush.bf16.msra.mxu0 %v1238_v38  ;;  %582 = vmatpush.bf16.msra.mxu1 %v1242_v39 }
  0x9c   : > { %569 = vmatpush.bf16.msra.mxu0 %v1230_v44  ;;  %583 = vmatpush.bf16.msra.mxu1 %v1234_v45 }
  0xa0   : > { %570 = vmatpush.bf16.msra.mxu0 %v1222_v50  ;;  %584 = vmatpush.bf16.msra.mxu1 %v1226_v51 }
  0xa3   : > { %571 = vmatmul.bf16.vlgmr.msra.gmra.mxu0 %v1424_v52  ;;  %585 = vmatmul.bf16.vlgmr.msra.gmra.mxu1 %v1424_v52 }
 0x120   : > { %v586_v56 = vpop.f32.mrf.mxu1  ;;  %v572_v57 = vpop.f32.mrf.mxu0 }
 0x121   : > { %v594_v59 = vrot.slane %v586_v56, 6 }
 0x128   : > { %v588_v58 = vpop.f32.mrf.mxu1  ;;  %v574_v61 = vpop.f32.mrf.mxu0 }
 0x129   : > { %v595_v60 = vrot.slane %v588_v58, 6 }
 0x12b   : > { %v597_v62 = vsel %vm596_vm0, %v594_v59, %v595_v60  ;;  %v2351_v63 = vsel %vm596_vm0, %v595_v60, %v594_v59  ;;  %614 = sbr.rel (%p1283_p1) target bundleno = 472 (0x1d8), region = 72 }
 0x12c   : > { %v605_v4 = vsel %vm599_vm1, %v2351_v63, 0.0  ;;  %v608_v5 = vadd.f32 %v597_v62, %v574_v61 }
 0x12d   : > { %v607_v6 = vadd.f32 %v605_v4, %v572_v57 }
 0x12e   : > { %610 = vst [vmem:[#allocation2] sm:$0xff] %v608_v5 }
 0x12f   : > { %609 = vst [vmem:[#allocation2 + $0x8] sm:$0xff] %v607_v6 }
 0x130   : > { %v1314_v7 = vld [vmem:[#allocation9 + $0x74] sm:$0xf]  ;;  %v1448_v8 = vld [vmem:[#allocation9 + $0x78] sm:$0xf0]  ;;  %v1310_v9 = vld [vmem:[#allocation9 + $0x64] sm:$0xf] }
 0x131   : > { %v1315_v10 = vor.u32 %v1448_v8, %v1314_v7  ;;  %v1447_v11 = vld [vmem:[#allocation9 + $0x68] sm:$0xf0]  ;;  %v1306_v13 = vld [vmem:[#allocation9 + $0x54] sm:$0xf]  ;;  %v1446_v14 = vld [vmem:[#allocation9 + $0x58] sm:$0xf0] }
 0x132   : > { %v1311_v12 = vor.u32 %v1447_v11, %v1310_v9  ;;  %v1307_v15 = vor.u32 %v1446_v14, %v1306_v13  ;;  %v1302_v16 = vld [vmem:[#allocation9 + $0x44] sm:$0xf]  ;;  %v1445_v17 = vld [vmem:[#allocation9 + $0x48] sm:$0xf0]  ;;  %v1298_v19 = vld [vmem:[#allocation9 + $0x34] sm:$0xf] }
 0x133   : > { %685 = vmatpush.bf16.msra.mxu0 %v1315_v10  ;;  %v1303_v18 = vor.u32 %v1445_v17, %v1302_v16  ;;  %v1444_v20 = vld [vmem:[#allocation9 + $0x38] sm:$0xf0]  ;;  %v1294_v22 = vld [vmem:[#allocation9 + $0x24] sm:$0xf]  ;;  %v1443_v23 = vld [vmem:[#allocation9 + $0x28] sm:$0xf0] }
 0x134   : > { %v1299_v21 = vor.u32 %v1444_v20, %v1298_v19  ;;  %v1295_v24 = vor.u32 %v1443_v23, %v1294_v22  ;;  %v615_v25 = vld [vmem:[%s380_s7] sm:$0xf]  ;;  %v1442_v27 = vld [vmem:[#allocation9 + $0x18] sm:$0xf0]  ;;  %v1286_v30 = vld [vmem:[#allocation9 + $0x4] sm:$0xf] }
 0x135   : > { %v1290_v26 = vld [vmem:[#allocation9 + $0x14] sm:$0xf]  ;;  %v633_v28 = vunpack.c.l.b16 %v615_v25  ;;  %v1441_v31 = vld [vmem:[#allocation9 + $0x8] sm:$0xf0] }
 0x136   : > { %v1291_v29 = vor.u32 %v1442_v27, %v1290_v26  ;;  %v1287_v33 = vor.u32 %v1441_v31, %v1286_v30 }
 0x137   : > { %686 = vmatpush.bf16.msra.mxu0 %v1311_v12  ;;  %v634_v32 = vpack.c.b16 %v633_v28, %v633_v28 }
 0x139   : > { %v635_v34 = vrot.slane %v634_v32, 3 }
 0x13b   : > { %687 = vmatpush.bf16.msra.mxu0 %v1307_v15 }
 0x13f   : > { %688 = vmatpush.bf16.msra.mxu0 %v1303_v18 }
 0x143   : > { %689 = vmatpush.bf16.msra.mxu0 %v1299_v21 }
 0x147   : > { %690 = vmatpush.bf16.msra.mxu0 %v1295_v24 }
 0x14b   : > { %691 = vmatpush.bf16.msra.mxu0 %v1291_v29 }
 0x14f   : > { %692 = vmatpush.bf16.msra.mxu0 %v1287_v33 }
 0x152   : > { %693 = vmatmul.bf16.vlgmr.msra.gmra.mxu0 %v635_v34 }
 0x1cf   : > { %v694_v35 = vpop.f32.mrf.mxu0 }
 0x1d0   : > { %v698_v36 = vadd.f32 %v694_v35, %v572_v57 }
 0x1d2   : > { %699 = vst [vmem:[#allocation2 + $0x8] sm:$0x3] %v698_v36 }
 0x1d7   : > { %v696_v37 = vpop.f32.mrf.mxu0 }
 0x1d8 PF: > { %v700_v38 = vrot.slane %v607_v6, 2  ;;  %v701_v39 = vrot.slane %v608_v5, 2  ;;  %vm702_vm2 = vcmp.lt.s32.totalorder %v2344_v54, 6  ;;  %v707_v40 = vstv %s1214_s6  ;;  %s2366_s17 = sadd.s32 16, %s1214_s6 }
 0x1d9   : > { %v708_v41 = vadd.s32 %v707_v40, %v2344_v54  ;;  %v709_v42 = vadd.s32 %v707_v40, %v2347_v55  ;;  %vm706_vm3 = vcmp.lt.s32.totalorder %v2347_v55, 14  ;;  %p1316_p3 = scmp.ge.s32.totalorder %s2366_s17, 37 }
 0x1da   : > { %v703_v43 = vsel %vm702_vm2, %v700_v38, %v701_v39  ;;  %v704_v46 = vsel %vm702_vm2, %v701_v39, %v700_v38 }
 0x1db   : > { %v710_v44 = vadd.s32 2, %v708_v41  ;;  %v711_v45 = vadd.s32 2, %v709_v42 }
 0x1dc   : > { %728 = sbr.rel (%p1316_p3) target bundleno = 649 (0x289), region = 76 }
 0x1dd   : > { %vm712_vm4 = vcmp.lt.s32.totalorder %v710_v44, 37  ;;  %vm713_vm5 = vcmp.lt.s32.totalorder %v711_v45, 37 }
 0x1de   : > { %v720_v47 = vsel %vm712_vm4, %v703_v43, 0.0  ;;  %vm715_vm6 = vmand %vm706_vm3, %vm713_vm5 }
 0x1df   : > { %722 = vst [vmem:[#allocation2 + $0x18] sm:$0xff] %v720_v47  ;;  %v721_v48 = vsel %vm715_vm6, %v704_v46, 0.0 }
 0x1e0   : > { %723 = vst [vmem:[#allocation2 + $0x10] sm:$0xff] %v721_v48 }
 0x1e1   : > { %v1347_v49 = vld [vmem:[#allocation9 + $0x70] sm:$0xf]  ;;  %v1456_v50 = vld [vmem:[#allocation9 + $0x74] sm:$0xf0]  ;;  %v1343_v51 = vld [vmem:[#allocation9 + $0x60] sm:$0xf]  ;;  %v808_v16 = vstv %s2366_s17 }
 0x1e2   : > { %v1348_v52 = vor.u32 %v1456_v50, %v1347_v49  ;;  %v1455_v53 = vld [vmem:[#allocation9 + $0x64] sm:$0xf0]  ;;  %v1339_v55 = vld [vmem:[#allocation9 + $0x50] sm:$0xf]  ;;  %v1454_v57 = vld [vmem:[#allocation9 + $0x54] sm:$0xf0]  ;;  %v809_v17 = vadd.s32 %v808_v16, %v2344_v54 }
 0x1e3   : > { %v1344_v56 = vor.u32 %v1455_v53, %v1343_v51  ;;  %v1340_v58 = vor.u32 %v1454_v57, %v1339_v55  ;;  %v1335_v59 = vld [vmem:[#allocation9 + $0x40] sm:$0xf]  ;;  %v1453_v60 = vld [vmem:[#allocation9 + $0x44] sm:$0xf0]  ;;  %v1331_v62 = vld [vmem:[#allocation9 + $0x30] sm:$0xf] }
 0x1e4   : > { %794 = vmatpush.bf16.msra.mxu0 %v1348_v52  ;;  %v1336_v61 = vor.u32 %v1453_v60, %v1335_v59  ;;  %v1452_v4 = vld [vmem:[#allocation9 + $0x34] sm:$0xf0]  ;;  %v1327_v6 = vld [vmem:[#allocation9 + $0x20] sm:$0xf]  ;;  %v1451_v7 = vld [vmem:[#allocation9 + $0x24] sm:$0xf0] }
 0x1e5   : > { %v1332_v5 = vor.u32 %v1452_v4, %v1331_v62  ;;  %v1328_v8 = vor.u32 %v1451_v7, %v1327_v6  ;;  %v1323_v9 = vld [vmem:[#allocation9 + $0x10] sm:$0xf]  ;;  %v1450_v10 = vld [vmem:[#allocation9 + $0x14] sm:$0xf0]  ;;  %v1319_v12 = vld [vmem:[#allocation9] sm:$0xf] }
 0x1e6   : > { %v1324_v11 = vor.u32 %v1450_v10, %v1323_v9  ;;  %v1449_v13 = vld [vmem:[#allocation9 + $0x4] sm:$0xf0]  ;;  %v729_v15 = vld [vmem:[%s390_s4] sm:$0xf]  ;;  %vm810_vm7 = vcmp.lt.s32.totalorder %v809_v17, 37 }
 0x1e7   : > { %v1320_v14 = vor.u32 %v1449_v13, %v1319_v12 }
 0x1e8   : > { %795 = vmatpush.bf16.msra.mxu0 %v1344_v56 }
 0x1ec   : > { %796 = vmatpush.bf16.msra.mxu0 %v1340_v58 }
 0x1f0   : > { %797 = vmatpush.bf16.msra.mxu0 %v1336_v61 }
 0x1f4   : > { %798 = vmatpush.bf16.msra.mxu0 %v1332_v5 }
 0x1f8   : > { %799 = vmatpush.bf16.msra.mxu0 %v1328_v8 }
 0x1fc   : > { %800 = vmatpush.bf16.msra.mxu0 %v1324_v11 }
 0x200   : > { %801 = vmatpush.bf16.msra.mxu0 %v1320_v14 }
 0x203   : > { %802 = vmatmul.bf16.vlgmr.msra.gmra.mxu0 %v729_v15 }
 0x280   : > { %v803_v18 = vpop.f32.mrf.mxu0 }
 0x281   : > { %v807_v19 = vadd.f32 %v803_v18, %v2351_v63 }
 0x283   : > { %v813_v20 = vsel %vm810_vm7, %v807_v19, 0.0 }
 0x284   : > { %v815_v21 = vrot.slane %v813_v20, 2 }
 0x286   : > { %817 = vst [vmem:[#allocation2 + $0x10] sm:$0xc0] %v815_v21 }
 0x288   : > { %v805_v22 = vpop.f32.mrf.mxu0 }
 0x289 PF: > { %v1464_v23 = vld [vmem:[#allocation11 + $0x38] sm:$0xff]  ;;  %v1463_v25 = vld [vmem:[#allocation11 + $0x30] sm:$0xff]  ;;  %v1462_v27 = vld [vmem:[#allocation11 + $0x28] sm:$0xff]  ;;  %s2525_s13 = sld [smem:[#allocation26_spill]]  ;;  %v856_v43 = vperm.slane %v2337_v1, 0  ;;  %v983_v49 = vperm.slane %v2339_v2, 0  ;;  %v989_v55 = vunpack.c.l.bf16 %v2335_v0  ;;  %v990_v57 = vunpack.c.h.bf16 %v2335_v0 }
 0x28a   : > { %v1472_v24 = vld [vmem:[#allocation11 + $0x78] sm:$0xff]  ;;  %953 = vmatpush.bf16.msra.mxu0 %v1464_v23  ;;  %v1471_v26 = vld [vmem:[#allocation11 + $0x70] sm:$0xff]  ;;  %v1470_v28 = vld [vmem:[#allocation11 + $0x68] sm:$0xff]  ;;  %s2526_s22 = sld [smem:[#allocation25_spill]]  ;;  %v986_v52 = vperm.slane %v2341_v3, 0  ;;  %s1014_s5 = sshll.u32 %s2356_s11, 4  ;;  %s1015_s5 = int_to_ptr.vmem [resolvable:$true] %s1014_s5 }
 0x28b   : > { %967 = vmatpush.bf16.msra.mxu1 %v1472_v24  ;;  %v1461_v54 = vld [vmem:[#allocation11 + $0x20] sm:$0xff]  ;;  %v1460_v63 = vld [vmem:[#allocation11 + $0x18] sm:$0xff]  ;;  %v1459_v31 = vld [vmem:[#allocation11 + $0x10] sm:$0xff]  ;;  %s2527_s0 = sld [smem:[#allocation41_spill]]  ;;  %v991_v59 = vmul.f32 0.66, %v989_v55 }
 0x28c   : > { %v1469_v29 = vld [vmem:[#allocation11 + $0x60] sm:$0xff]  ;;  %v1468_v30 = vld [vmem:[#allocation11 + $0x58] sm:$0xff]  ;;  %v1467_v32 = vld [vmem:[#allocation11 + $0x50] sm:$0xff]  ;;  %v992_v3 = vmul.f32 0.66, %v990_v57  ;;  %s1000_s30 = scalar_lea.sflag [#allocation5], %s2296_s15 }
 0x28d   : > { %v1458_v33 = vld [vmem:[#allocation11 + $0x8] sm:$0xff]  ;;  %v1457_v35 = vld [vmem:[#allocation11] sm:$0xff] }
 0x28e   : > { %954 = vmatpush.bf16.msra.mxu0 %v1463_v25  ;;  %v1466_v34 = vld [vmem:[#allocation11 + $0x48] sm:$0xff]  ;;  %v1465_v36 = vld [vmem:[#allocation11 + $0x40] sm:$0xff]  ;;  %v819_v39 = vld [vmem:[#allocation2 + $0x18] sm:$0xff] }
 0x28f   : > { %968 = vmatpush.bf16.msra.mxu1 %v1471_v26  ;;  %v818_v37 = vld [vmem:[#allocation2 + $0x8] sm:$0xff]  ;;  %v820_v38 = vld [vmem:[#allocation2] sm:$0xff]  ;;  %v821_v40 = vld [vmem:[#allocation2 + $0x10] sm:$0xff]  ;;  %s1481_s14 = smul.u32 6, %s2525_s13 }
 0x290   : > { %v822_v41 = vpack.c.bf16 %v820_v38, %v818_v37  ;;  %v823_v42 = vpack.c.bf16 %v821_v40, %v819_v39  ;;  %s1414_s9 = sshll.u32 %s2526_s22, 1 }
 0x291   : > { %s1011_s20 = sadd.s32 %s1481_s14, %s1414_s9  ;;  %s1855_s6 = scalar_lea.hbm %s2527_s0, 48 }
 0x292   : > { %955 = vmatpush.bf16.msra.mxu0 %v1462_v27  ;;  %s1415_s25 = sshll.u32 %s1011_s20, 2 }
 0x293   : > { %969 = vmatpush.bf16.msra.mxu1 %v1470_v28  ;;  %s1013_s3 = scalar_lea.hbm %s2527_s0, %s1415_s25 }
 0x294   : > { %s1016_s7 = sshll.u32 %s1013_s3, 4  ;;  %s1017_s7 = int_to_ptr.hbm [resolvable:$true] %s1016_s7 }
 0x295   : > { %s1849_s12 = sshra.s32 %s1017_s7, 4  ;;  %s1850_s12 = int_to_ptr.hbm [resolvable:$true] %s1849_s12 }
 0x296   : > { %956 = vmatpush.bf16.msra.mxu0 %v1461_v54  ;;  %s1851_s18 = scalar_lea.hbm %s1850_s12, 8  ;;  %p1856_p12 = scmp.lt.s32.totalorder %s1850_s12, %s2527_s0 }
 0x297   : > { %970 = vmatpush.bf16.msra.mxu1 %v1469_v29  ;;  %p1852_p2 = scmp.ne.s32.totalorder %s1850_s12, %s1851_s18  ;;  %p1857_p13 = scmp.lt.s32.totalorder %s1855_s6, %s1851_s18 }
 0x299   : > { %p1853_p8 = pnand %p1852_p2, %p2237_p5  ;;  %p1858_p0 = por %p1857_p13, %p1856_p12 }
 0x29a   : > { %957 = vmatpush.bf16.msra.mxu0 %v1460_v63 }
 0x29b   : > { %971 = vmatpush.bf16.msra.mxu1 %v1468_v30  ;;  %p1854_p9 = pneg %p1853_p8 }
 0x29d   : > { %p1859_p4 = pnand %p1858_p0, %p1854_p9 }
 0x29e   : > { %958 = vmatpush.bf16.msra.mxu0 %v1459_v31 }
 0x29f   : > { %972 = vmatpush.bf16.msra.mxu1 %v1467_v32 }
 0x2a2   : > { %959 = vmatpush.bf16.msra.mxu0 %v1458_v33 }
 0x2a3   : > { %973 = vmatpush.bf16.msra.mxu1 %v1466_v34 }
 0x2a6   : > { %960 = vmatpush.bf16.msra.mxu0 %v1457_v35 }
 0x2a7   : > { %974 = vmatpush.bf16.msra.mxu1 %v1465_v36 }
 0x2a9   : > { %961 = vmatmul.bf16.vlgmr.msra.gmra.mxu0 %v822_v41 }
 0x2aa   : > { %975 = vmatmul.bf16.vlgmr.msra.gmra.mxu1 %v823_v42 }
 0x326   : > { %v962_v44 = vpop.f32.mrf.mxu0 }
 0x327   : > { %v976_v45 = vpop.f32.mrf.mxu1  ;;  %v963_v46 = vadd.f32 %v962_v44, %v856_v43 }
 0x329   : > { %v977_v47 = vadd.f32 %v976_v45, %v963_v46 }
 0x32b   : > { %v981_v48 = vmax.f32 %v977_v47, 0.0 }
 0x32d   : > { %v984_v56 = vmul.f32 %v983_v49, %v981_v48 }
 0x32e   : > { %v964_v50 = vpop.f32.mrf.mxu0 }
 0x32f   : > { %v965_v51 = vadd.f32 %v964_v50, %v856_v43  ;;  %v978_v53 = vpop.f32.mrf.mxu1  ;;  %v987_v2 = vadd.f32 %v986_v52, %v984_v56 }
 0x331   : > { %v979_v1 = vadd.f32 %v978_v53, %v965_v51  ;;  %v993_v62 = vadd.f32 %v991_v59, %v987_v2 }
 0x333   : > { %v982_v58 = vmax.f32 %v979_v1, 0.0 }
 0x335   : > { %v985_v60 = vmul.f32 %v983_v49, %v982_v58 }
 0x337   : > { %v988_v61 = vadd.f32 %v986_v52, %v985_v60 }
 0x339   : > { %v994_v4 = vadd.f32 %v992_v3, %v988_v61 }
 0x33b   : > { %v1476_v0 = vpack.c.bf16 %v994_v4, %v993_v62 }
 0x33d   : > { %1477 = vst [vmem:[%s2356_s11] sm:$0xff] %v1476_v0  }
 0x33e   : > { %1862 = shalt.err (!%p1859_p4)
}
 0x33f   : > { %s2006_s15 = smov 64   ;;  %s2007_s11 = smov 4  }
 0x340   : > { %1500 = dma.vmem_to_hbm [thread:$0]  (%p2237_p5), %s1015_s5, 128, %s1017_s7, %s1000_s30, %s2006_s15, %s2006_s15, %s2007_s11  }
 0x341 PF: > { %p1533_p10 = scmp.ge.s32.totalorder %s1997_s10, 2  ;;  %s1031_s13 = sand.u32 1, %s1969_s27  }
 0x342   : > { %s1032_s22 = scalar_lea.sflag [#allocation5], %s1031_s13 }
 0x343   : > { %p1523_p7 = pnand %p1533_p10, %p2241_p11 }
 0x345   : > { %p1524_p6 = pneg %p1523_p7 }
 0x347   : > { %1940 = dma.done.wait (%p1524_p6), %s1032_s22, 128  }
 0x348   : > { %1942 = vsyncadd (%p1524_p6), %s1032_s22, 4294967168  ;;  %s27_s10 = sadd.s32 1, %s1997_s10   ;;  %s2529_s21 = sld [smem:[#allocation22_spill]] }
 0x349   : > { %p2405_p1 = scmp.ge.s32.totalorder %s27_s10, 8   ;;  %s2530_s24 = sld [smem:[#allocation23_spill]] }
 0x34a   : > { %s2531_s8 = sld [smem:[#allocation24_spill]]  ;;  %s2537_s22 = smov %s1953_s23 }
 0x34b   : > { %s2532_s9 = sld [smem:[#allocation34_spill]]  ;;  %s2538_s23 = smov %s2283_s29 }
 0x34c   : > { %s2533_s30 = sld [smem:[#allocation27_spill]]  ;;  %s2539_s25 = smov %s1965_s26 }
 0x34d   : > { %s2534_s7 = sld [smem:[#allocation28_spill]]  ;;  %s2540_s26 = smov %s2185_s2 }
 0x34e   : > { %s2535_s20 = sld [smem:[#allocation30_spill]]  ;;  %s2541_s27 = smov %s1973_s28 }
 0x34f   : > { %s2536_s16 = sld [smem:[#allocation31_spill]] }
 0x350   : > { %s2542_s28 = smov %s2531_s8 }
 0x351   : > { %s2543_s29 = smov %s2532_s9  ;;  %26 = sbr.rel (!%p2405_p1) target bundleno = 22 (0x16), region = 133 }
 0x354   : > { %s2544_s8 = smov %s2535_s20 }
 0x355   : > { %s2545_s9 = smov %s2536_s16 }
 0x356   :  { %1038 = vsyncpa [#allocation4], 1 }
 0x357   :  { %1040 = vsyncpa [#allocation4 + $0x1], 1 }
 0x358   :  { %1041 = vsyncpa [#allocation7], 1 }
 0x359   :  { %1043 = vsyncpa [#allocation7 + $0x1], 1 }
 0x35a   :  { %1044 = vsyncpa [#allocation10], 1 }
 0x35b   :  { %1045 = vsyncpa [#allocation13], 1 }
 0x35c   :  { %1046 = vsyncpa [#allocation5], 1 }
 0x35d   :  { %1048 = vsyncpa [#allocation5 + $0x1], 1 }

</bundles_post_ra>
